<compile_context>
chip_gen: v7x
topology: tpu7x:2x2x1
jax: 0.10.0
libtpu: 0.0.40
codegen_flags: <defaults>
</compile_context>

<pallas_src>
import jax
import jax.numpy as jnp
from jax import lax
from jax.experimental import pallas as pl
from jax.experimental.pallas import tpu as pltpu


_BATCH_BLOCK = 8                       # f32 sublane tile; batch-grid block size
_VMEM_LIMIT_BYTES = 48 * 1024 * 1024   # > default scoped limit, < physical VMEM on all gens


# ----------------------------------------------------------------------------
# Fused BiLSTM + time-MaxPool (+ optional Linear) stage kernel
# ----------------------------------------------------------------------------
def _bilstm_pool_body(x_ref, len_ref, wi_ref, whf_ref, whb_ref, b_ref,
                      out_ref, gin_f_ref, gin_b_ref, hf_seq_ref, hb_seq_ref,
                      *, pool_k, wo_ref, bo_ref):
    T, Bb, D = x_ref.shape
    H = whf_ref.shape[0]
    H4 = 4 * H
    lens = len_ref[...]                                    # (Bb, 1) int32

    # ---- Phase 1: input projection for both directions and all T steps as
    # ONE big MXU matmul, hoisted off the serial recurrence path. -----------
    x_flat = x_ref[...].reshape(T * Bb, D)                 # layout-trivial (Bb == 8)
    gin = (jnp.dot(x_flat, wi_ref[...], preferred_element_type=jnp.float32)
           + b_ref[...])                                   # (T*Bb, 8H)
    gin_f_ref[...] = gin[:, 0:H4]
    gin_b_ref[...] = gin[:, H4:2 * H4]

    # ---- Phase 2: forward & backward recurrences interleaved in one loop
    # (two independent dependence chains -> latency hiding). ----------------
    whf = whf_ref[...]
    whb = whb_ref[...]

    def lstm_cell(gates, h, c, t):
        # PyTorch nn.LSTM gate order: i, f, g, o
        i_g = jax.nn.sigmoid(gates[:, 0:H])
        f_g = jax.nn.sigmoid(gates[:, H:2 * H])
        g_g = jnp.tanh(gates[:, 2 * H:3 * H])
        o_g = jax.nn.sigmoid(gates[:, 3 * H:4 * H])
        c_new = f_g * c + i_g * g_g
        h_new = o_g * jnp.tanh(c_new)
        valid = t < lens                                   # (Bb, 1)
        h_out = jnp.where(valid, h_new, 0.0)     # pad_packed: padded steps -> 0
        return (jnp.where(valid, h_new, h),      # packed: state frozen past len
                jnp.where(valid, c_new, c),
                h_out)

    def body(i, carry):
        hf, cf, hb, cb = carry
        tf = i
        tb = T - 1 - i
        gf_in = gin_f_ref[pl.ds(pl.multiple_of(tf * Bb, Bb), Bb)]   # (Bb, 4H)
        gb_in = gin_b_ref[pl.ds(pl.multiple_of(tb * Bb, Bb), Bb)]   # (Bb, 4H)
        gf = gf_in + jnp.dot(hf, whf, preferred_element_type=jnp.float32)
        gb = gb_in + jnp.dot(hb, whb, preferred_element_type=jnp.float32)
        hf, cf, hf_out = lstm_cell(gf, hf, cf, tf)
        hb, cb, hb_out = lstm_cell(gb, hb, cb, tb)
        hf_seq_ref[tf] = hf_out
        hb_seq_ref[tb] = hb_out
        return (hf, cf, hb, cb)

    z = jnp.zeros((Bb, H), jnp.float32)
    lax.fori_loop(0, T, body, (z, z, z, z))

    # ---- Phase 3 (epilogue): fused MaxPool1d over time (kernel==stride==k);
    # for the last stage, also the fused output Linear + batch-first store. --
    T_out = (T - pool_k) // pool_k + 1
    span = T_out * pool_k
    pooled_f = jnp.max(hf_seq_ref[0:span].reshape(T_out, pool_k, Bb, H), axis=1)
    pooled_b = jnp.max(hb_seq_ref[0:span].reshape(T_out, pool_k, Bb, H), axis=1)

    if wo_ref is None:
        # time-major (T_out, Bb, 2H) output feeding the next stage
        out_ref[:, :, 0:H] = pooled_f
        out_ref[:, :, H:2 * H] = pooled_b
    else:
        # Output Linear hoisted to two large MXU matmuls over ALL pooled rows
        # (instead of 2*Bb tiny per-batch-row matmuls).
        O = wo_ref.shape[1]
        y = (jnp.dot(pooled_f.reshape(T_out * Bb, H), wo_ref[0:H, :],
                     preferred_element_type=jnp.float32)
             + jnp.dot(pooled_b.reshape(T_out * Bb, H), wo_ref[H:2 * H, :],
                       preferred_element_type=jnp.float32)
             + bo_ref[...])                                # (T_out*Bb, O)
        y = y.reshape(T_out, Bb, O)
        for bl in range(Bb):                               # Bb static & small -> unrolled
            out_ref[bl] = y[:, bl, :]                      # (T_out, O), batch-first store


def _make_stage_kernel(pool_k, fuse_linear):
    if fuse_linear:
        def kernel(x_ref, len_ref, wi_ref, whf_ref, whb_ref, b_ref, wo_ref, bo_ref,
                   out_ref, gin_f_ref, gin_b_ref, hf_seq_ref, hb_seq_ref):
            _bilstm_pool_body(x_ref, len_ref, wi_ref, whf_ref, whb_ref, b_ref,
                              out_ref, gin_f_ref, gin_b_ref, hf_seq_ref, hb_seq_ref,
                              pool_k=pool_k, wo_ref=wo_ref, bo_ref=bo_ref)
    else:
        def kernel(x_ref, len_ref, wi_ref, whf_ref, whb_ref, b_ref,
                   out_ref, gin_f_ref, gin_b_ref, hf_seq_ref, hb_seq_ref):
            _bilstm_pool_body(x_ref, len_ref, wi_ref, whf_ref, whb_ref, b_ref,
                              out_ref, gin_f_ref, gin_b_ref, hf_seq_ref, hb_seq_ref,
                              pool_k=pool_k, wo_ref=None, bo_ref=None)
    return kernel


# ----------------------------------------------------------------------------
# pallas_call wrapper for one stage
# ----------------------------------------------------------------------------
def _blstm_pool_stage(x_tbd, lens_col, p, pool_k, bb, w_out=None, b_out=None):
    """x_tbd: (T, Bp, D) f32 time-major; lens_col: (Bp, 1) int32.

    Returns (T_out, Bp, 2H) time-major if w_out is None, else (Bp, T_out, O)
    batch-first with the output Linear fused into the kernel epilogue.
    """
    T, Bp, D = x_tbd.shape
    H = p["whf"].shape[0]
    T_out = (T - pool_k) // pool_k + 1
    fuse_linear = w_out is not None
    assert Bp % bb == 0

    wi = jnp.concatenate([p["wif"], p["wib"]], axis=1)     # (D, 8H)
    bias = jnp.concatenate([p["bf"], p["bb"]], axis=1)     # (1, 8H)

    def _w(shape):
        n = len(shape)
        return pl.BlockSpec(shape, lambda b, _n=n: (0,) * _n)   # weights stay resident

    in_specs = [
        pl.BlockSpec((T, bb, D), lambda b: (0, b, 0)),     # activations: batch-blocked
        pl.BlockSpec((bb, 1), lambda b: (b, 0)),           # lengths
        _w((D, 8 * H)), _w((H, 4 * H)), _w((H, 4 * H)), _w((1, 8 * H)),
    ]
    args = [x_tbd, lens_col, wi, p["whf"], p["whb"], bias]
    if fuse_linear:
        O = w_out.shape[1]
        in_specs += [_w((2 * H, O)), _w((1, O))]
        args += [w_out, b_out]
        out_spec = pl.BlockSpec((bb, T_out, O), lambda b: (b, 0, 0))
        out_shape = jax.ShapeDtypeStruct((Bp, T_out, O), jnp.float32)
    else:
        out_spec = pl.BlockSpec((T_out, bb, 2 * H), lambda b: (0, b, 0))
        out_shape = jax.ShapeDtypeStruct((T_out, Bp, 2 * H), jnp.float32)

    return pl.pallas_call(
        _make_stage_kernel(pool_k, fuse_linear),
        grid=(Bp // bb,),
        in_specs=in_specs,
        out_specs=out_spec,
        out_shape=out_shape,
        scratch_shapes=[
            pltpu.VMEM((T * bb, 4 * H), jnp.float32),      # fwd input-gate pre-acts
            pltpu.VMEM((T * bb, 4 * H), jnp.float32),      # bwd input-gate pre-acts
            pltpu.VMEM((T, bb, H), jnp.float32),           # fwd hidden sequence
            pltpu.VMEM((T, bb, H), jnp.float32),           # bwd hidden sequence
        ],
        compiler_params=pltpu.CompilerParams(
            dimension_semantics=("parallel",),
            vmem_limit_bytes=_VMEM_LIMIT_BYTES),
    )(*args)


# ----------------------------------------------------------------------------
# Parameters / module-level forward
# ----------------------------------------------------------------------------
def _closest_factors(n):
    f = int(n ** 0.5)
    while n % f != 0:
        f -= 1
    return max(f, n // f), min(f, n // f)


def _init_lstm_dir_params(key, in_dim, hidden):
    ks = jax.random.split(key, 6)
    s = 1.0 / float(hidden) ** 0.5

    def u(k, shape):
        return jax.random.uniform(k, shape, jnp.float32, -s, s)

    return {
        "wif": u(ks[0], (in_dim, 4 * hidden)),   # W_ih forward (transposed, i|f|g|o)
        "whf": u(ks[1], (hidden, 4 * hidden)),   # W_hh forward (transposed)
        "bf":  u(ks[2], (1, 4 * hidden)),        # b_ih + b_hh forward
        "wib": u(ks[3], (in_dim, 4 * hidden)),   # reverse direction
        "whb": u(ks[4], (hidden, 4 * hidden)),
        "bb":  u(ks[5], (1, 4 * hidden)),
    }


def init_speech_embedding_params(key, input_dim, output_dim, time_reduction=6):
    """Default SpeechEmbedding: reduction_method='lstm' -> StackedBLSTMEmbedding."""
    stride1, stride2 = _closest_factors(time_reduction)
    hidden = output_dim
    h_dir = hidden // 2
    k1, k2, k3, k4 = jax.random.split(key, 4)
    s = 1.0 / float(hidden) ** 0.5
    return {
        "stride1": stride1,
        "stride2": stride2,
        "blstm1": _init_lstm_dir_params(k1, input_dim, h_dir),
        "blstm2": _init_lstm_dir_params(k2, hidden, h_dir),
        "w_out": jax.random.uniform(k3, (hidden, output_dim), jnp.float32, -s, s),
        "b_out": jax.random.uniform(k4, (1, output_dim), jnp.float32, -s, s),
    }


def _pool_out_len(lengths, k):
    # L_out = floor((L + 2*0 - 1*(k-1) - 1)/k + 1)
    return (lengths - k) // k + 1


def speech_embedding_forward(params, x, x_len):
    """x: (B, T, input_dim) f32, x_len: (B,) int -> ((B, T_out, output_dim), (B,))."""
    B, T, _ = x.shape
    k1, k2 = params["stride1"], params["stride2"]

    bb = _BATCH_BLOCK
    Bp = -(-B // bb) * bb
    lens = x_len.astype(jnp.int32)
    if Bp != B:
        x = jnp.pad(x, ((0, Bp - B), (0, 0), (0, 0)))
        lens_p = jnp.pad(lens, (0, Bp - B))                # padded rows: length 0
    else:
        lens_p = lens

    x_t = jnp.transpose(x, (1, 0, 2))                      # (T, Bp, D) time-major

    # Stage 1: BLSTM1 + MaxPool1 fused (time-major output)
    y = _blstm_pool_stage(x_t, lens_p.reshape(Bp, 1), params["blstm1"], k1, bb)
    lens1 = _pool_out_len(lens_p, k1)

    # Stage 2: BLSTM2 + MaxPool2 + Linear fused, batch-first output
    out = _blstm_pool_stage(y, lens1.reshape(Bp, 1), params["blstm2"], k2, bb,
                            w_out=params["w_out"], b_out=params["b_out"])
    out = out[:B]                                          # drop batch padding rows

    out_len = _pool_out_len(_pool_out_len(lens, k1), k2)
    # Dropout(p=0.0) == identity
    return out, out_len


# ----------------------------------------------------------------------------
if __name__ == "__main__":
    key = jax.random.PRNGKey(0)
    B, T, D_in, D_out = 2, 12, 32, 32
    k_param, k_x = jax.random.split(key)

    params = init_speech_embedding_params(k_param, D_in, D_out, time_reduction=6)
    x = jax.random.normal(k_x, (B, T, D_in), jnp.float32)
    x_len = jnp.array([12, 9], dtype=jnp.int32)

    out, out_len = speech_embedding_forward(params, x, x_len)
    jax.block_until_ready(out)
    jax.block_until_ready(out_len)

    T1 = (T - 3) // 3 + 1
    T2 = (T1 - 2) // 2 + 1
    assert out.shape == (B, T2, D_out), out.shape
    assert out_len.shape == (B,)
    assert bool(jnp.all(jnp.isfinite(out)))
    print("KERNEL_OK")
</pallas_src>

<mosaic_0001>
module attributes {stable_mosaic.version = 11 : i64} {
  func.func @kernel(%arg0: i32, %arg1: memref<12x8x32xf32, #tpu.memory_space<vmem>>, %arg2: memref<8x1xi32, #tpu.memory_space<vmem>>, %arg3: memref<32x128xf32, #tpu.memory_space<vmem>>, %arg4: memref<16x64xf32, #tpu.memory_space<vmem>>, %arg5: memref<16x64xf32, #tpu.memory_space<vmem>>, %arg6: memref<1x128xf32, #tpu.memory_space<vmem>>, %arg7: memref<4x8x32xf32, #tpu.memory_space<vmem>>, %arg8: memref<96x64xf32, #tpu.memory_space<vmem>>, %arg9: memref<96x64xf32, #tpu.memory_space<vmem>>, %arg10: memref<12x8x16xf32, #tpu.memory_space<vmem>>, %arg11: memref<12x8x16xf32, #tpu.memory_space<vmem>>) attributes {dimension_semantics = [#tpu.dimension_semantics<parallel>], iteration_bounds = array<i64: 1>, scalar_prefetch = 0 : i64, scratch_operands = 4 : i64, tpu.core_type = #tpu.core_type<tc>, window_params = [{transform_indices = @transform_0, window_bounds = array<i64: 12, 8, 32>}, {transform_indices = @transform_1, window_bounds = array<i64: 8, 1>}, {pipeline_mode = #tpu.pipeline_mode<synchronous>, transform_indices = @transform_2, window_bounds = array<i64: 32, 128>}, {pipeline_mode = #tpu.pipeline_mode<synchronous>, transform_indices = @transform_3, window_bounds = array<i64: 16, 64>}, {pipeline_mode = #tpu.pipeline_mode<synchronous>, transform_indices = @transform_4, window_bounds = array<i64: 16, 64>}, {pipeline_mode = #tpu.pipeline_mode<synchronous>, transform_indices = @transform_5, window_bounds = array<i64: 1, 128>}, {transform_indices = @transform_6, window_bounds = array<i64: 4, 8, 32>}]} {
    %c0 = arith.constant 0 : index
    %c0_0 = arith.constant 0 : index
    %0 = vector.load %arg2[%c0, %c0_0] : memref<8x1xi32, #tpu.memory_space<vmem>>, vector<8x1xi32>
    %c0_1 = arith.constant 0 : index
    %c0_2 = arith.constant 0 : index
    %c0_3 = arith.constant 0 : index
    %1 = vector.load %arg1[%c0_1, %c0_2, %c0_3] : memref<12x8x32xf32, #tpu.memory_space<vmem>>, vector<12x8x32xf32>
    %2 = vector.shape_cast %1 : vector<12x8x32xf32> to vector<96x32xf32>
    %c0_4 = arith.constant 0 : index
    %c0_5 = arith.constant 0 : index
    %3 = vector.load %arg3[%c0_4, %c0_5] : memref<32x128xf32, #tpu.memory_space<vmem>>, vector<32x128xf32>
    %cst = arith.constant dense<0.000000e+00> : vector<96x128xf32>
    %4 = tpu.matmul %2, %3, %cst {dimension_numbers = #tpu.dot_dimension_numbers<[1], [0], [0], [1], [0, 0, 1, 1], [], []>} : vector<96x32xf32>, vector<32x128xf32>, vector<96x128xf32> -> vector<96x128xf32>
    %c0_6 = arith.constant 0 : index
    %c0_7 = arith.constant 0 : index
    %5 = vector.load %arg6[%c0_6, %c0_7] : memref<1x128xf32, #tpu.memory_space<vmem>>, vector<1x128xf32>
    %6 = vector.broadcast %5 : vector<1x128xf32> to vector<96x128xf32>
    %7 = arith.addf %4, %6 : vector<96x128xf32>
    %8 = vector.extract_strided_slice %7 {offsets = [0, 0], sizes = [96, 64], strides = [1, 1]} : vector<96x128xf32> to vector<96x64xf32>
    %c0_8 = arith.constant 0 : index
    %c0_9 = arith.constant 0 : index
    %9 = vector.load %arg8[%c0_8, %c0_9] : memref<96x64xf32, #tpu.memory_space<vmem>>, vector<96x64xf32>
    tpu.vector_store %arg8[%c0_8, %c0_9], %8 {strides = array<i32>} : memref<96x64xf32, #tpu.memory_space<vmem>>, vector<96x64xf32>,
    %10 = vector.extract_strided_slice %7 {offsets = [0, 64], sizes = [96, 64], strides = [1, 1]} : vector<96x128xf32> to vector<96x64xf32>
    %c0_10 = arith.constant 0 : index
    %c0_11 = arith.constant 0 : index
    %11 = vector.load %arg9[%c0_10, %c0_11] : memref<96x64xf32, #tpu.memory_space<vmem>>, vector<96x64xf32>
    tpu.vector_store %arg9[%c0_10, %c0_11], %10 {strides = array<i32>} : memref<96x64xf32, #tpu.memory_space<vmem>>, vector<96x64xf32>,
    %c0_12 = arith.constant 0 : index
    %c0_13 = arith.constant 0 : index
    %12 = vector.load %arg4[%c0_12, %c0_13] : memref<16x64xf32, #tpu.memory_space<vmem>>, vector<16x64xf32>
    %c0_14 = arith.constant 0 : index
    %c0_15 = arith.constant 0 : index
    %13 = vector.load %arg5[%c0_14, %c0_15] : memref<16x64xf32, #tpu.memory_space<vmem>>, vector<16x64xf32>
    %cst_16 = arith.constant 0.000000e+00 : f32
    %14 = vector.broadcast %cst_16 : f32 to vector<8x16xf32>
    %c0_i32 = arith.constant 0 : i32
    %c12_i32 = arith.constant 12 : i32
    %15 = arith.addi %c0_i32, %c12_i32 : i32
    %c1_i32 = arith.constant 1 : i32
    %16:4 = scf.for %arg12 = %c0_i32 to %15 step %c1_i32 iter_args(%arg13 = %14, %arg14 = %14, %arg15 = %14, %arg16 = %14) -> (vector<8x16xf32>, vector<8x16xf32>, vector<8x16xf32>, vector<8x16xf32>)  : i32 {
      %c11_i32 = arith.constant 11 : i32
      %25 = arith.subi %c11_i32, %arg12 : i32
      %c8_i32 = arith.constant 8 : i32
      %26 = arith.muli %arg12, %c8_i32 : i32
      %27 = tpu.assume_multiple %26, 8 : i32
      %28 = arith.index_cast %27 : i32 to index
      %c0_31 = arith.constant 0 : index
      %29 = vector.load %arg8[%28, %c0_31] : memref<96x64xf32, #tpu.memory_space<vmem>>, vector<8x64xf32>
      %c8_i32_32 = arith.constant 8 : i32
      %30 = arith.muli %25, %c8_i32_32 : i32
      %31 = tpu.assume_multiple %30, 8 : i32
      %32 = arith.index_cast %31 : i32 to index
      %c0_33 = arith.constant 0 : index
      %33 = vector.load %arg9[%32, %c0_33] : memref<96x64xf32, #tpu.memory_space<vmem>>, vector<8x64xf32>
      %cst_34 = arith.constant dense<0.000000e+00> : vector<8x64xf32>
      %34 = tpu.matmul %arg13, %12, %cst_34 {dimension_numbers = #tpu.dot_dimension_numbers<[1], [0], [0], [1], [0, 0, 1, 1], [], []>} : vector<8x16xf32>, vector<16x64xf32>, vector<8x64xf32> -> vector<8x64xf32>
      %35 = arith.addf %29, %34 : vector<8x64xf32>
      %cst_35 = arith.constant dense<0.000000e+00> : vector<8x64xf32>
      %36 = tpu.matmul %arg15, %13, %cst_35 {dimension_numbers = #tpu.dot_dimension_numbers<[1], [0], [0], [1], [0, 0, 1, 1], [], []>} : vector<8x16xf32>, vector<16x64xf32>, vector<8x64xf32> -> vector<8x64xf32>
      %37 = arith.addf %33, %36 : vector<8x64xf32>
      %38 = vector.extract_strided_slice %35 {offsets = [0, 0], sizes = [8, 16], strides = [1, 1]} : vector<8x64xf32> to vector<8x16xf32>
      %39 = arith.negf %38 : vector<8x16xf32>
      %40 = math.exp %39 : vector<8x16xf32>
      %cst_36 = arith.constant 1.000000e+00 : f32
      %41 = vector.broadcast %cst_36 : f32 to vector<8x16xf32>
      %42 = arith.addf %41, %40 : vector<8x16xf32>
      %43 = arith.divf %41, %42 : vector<8x16xf32>
      %44 = vector.extract_strided_slice %35 {offsets = [0, 16], sizes = [8, 16], strides = [1, 1]} : vector<8x64xf32> to vector<8x16xf32>
      %45 = arith.negf %44 : vector<8x16xf32>
      %46 = math.exp %45 : vector<8x16xf32>
      %cst_37 = arith.constant 1.000000e+00 : f32
      %47 = vector.broadcast %cst_37 : f32 to vector<8x16xf32>
      %48 = arith.addf %47, %46 : vector<8x16xf32>
      %49 = arith.divf %47, %48 : vector<8x16xf32>
      %50 = vector.extract_strided_slice %35 {offsets = [0, 32], sizes = [8, 16], strides = [1, 1]} : vector<8x64xf32> to vector<8x16xf32>
      %51 = math.tanh %50 : vector<8x16xf32>
      %52 = vector.extract_strided_slice %35 {offsets = [0, 48], sizes = [8, 16], strides = [1, 1]} : vector<8x64xf32> to vector<8x16xf32>
      %53 = arith.negf %52 : vector<8x16xf32>
      %54 = math.exp %53 : vector<8x16xf32>
      %cst_38 = arith.constant 1.000000e+00 : f32
      %55 = vector.broadcast %cst_38 : f32 to vector<8x16xf32>
      %56 = arith.addf %55, %54 : vector<8x16xf32>
      %57 = arith.divf %55, %56 : vector<8x16xf32>
      %58 = arith.mulf %49, %arg14 : vector<8x16xf32>
      %59 = arith.mulf %43, %51 : vector<8x16xf32>
      %60 = arith.addf %58, %59 : vector<8x16xf32>
      %61 = math.tanh %60 : vector<8x16xf32>
      %62 = arith.mulf %57, %61 : vector<8x16xf32>
      %63 = vector.broadcast %arg12 : i32 to vector<8x1xi32>
      %64 = arith.cmpi slt, %63, %0 : vector<8x1xi32>
      %cst_39 = arith.constant 0.000000e+00 : f32
      %65 = vector.shape_cast %64 : vector<8x1xi1> to vector<8x1xi1>
      %66 = vector.broadcast %65 : vector<8x1xi1> to vector<8x16xi1>
      %67 = vector.broadcast %cst_39 : f32 to vector<8x16xf32>
      %68 = arith.select %66, %62, %67 : vector<8x16xi1>, vector<8x16xf32>
      %69 = vector.shape_cast %64 : vector<8x1xi1> to vector<8x1xi1>
      %70 = vector.broadcast %69 : vector<8x1xi1> to vector<8x16xi1>
      %71 = arith.select %70, %62, %arg13 : vector<8x16xi1>, vector<8x16xf32>
      %72 = vector.shape_cast %64 : vector<8x1xi1> to vector<8x1xi1>
      %73 = vector.broadcast %72 : vector<8x1xi1> to vector<8x16xi1>
      %74 = arith.select %73, %60, %arg14 : vector<8x16xi1>, vector<8x16xf32>
      %75 = vector.extract_strided_slice %37 {offsets = [0, 0], sizes = [8, 16], strides = [1, 1]} : vector<8x64xf32> to vector<8x16xf32>
      %76 = arith.negf %75 : vector<8x16xf32>
      %77 = math.exp %76 : vector<8x16xf32>
      %cst_40 = arith.constant 1.000000e+00 : f32
      %78 = vector.broadcast %cst_40 : f32 to vector<8x16xf32>
      %79 = arith.addf %78, %77 : vector<8x16xf32>
      %80 = arith.divf %78, %79 : vector<8x16xf32>
      %81 = vector.extract_strided_slice %37 {offsets = [0, 16], sizes = [8, 16], strides = [1, 1]} : vector<8x64xf32> to vector<8x16xf32>
      %82 = arith.negf %81 : vector<8x16xf32>
      %83 = math.exp %82 : vector<8x16xf32>
      %cst_41 = arith.constant 1.000000e+00 : f32
      %84 = vector.broadcast %cst_41 : f32 to vector<8x16xf32>
      %85 = arith.addf %84, %83 : vector<8x16xf32>
      %86 = arith.divf %84, %85 : vector<8x16xf32>
      %87 = vector.extract_strided_slice %37 {offsets = [0, 32], sizes = [8, 16], strides = [1, 1]} : vector<8x64xf32> to vector<8x16xf32>
      %88 = math.tanh %87 : vector<8x16xf32>
      %89 = vector.extract_strided_slice %37 {offsets = [0, 48], sizes = [8, 16], strides = [1, 1]} : vector<8x64xf32> to vector<8x16xf32>
      %90 = arith.negf %89 : vector<8x16xf32>
      %91 = math.exp %90 : vector<8x16xf32>
      %cst_42 = arith.constant 1.000000e+00 : f32
      %92 = vector.broadcast %cst_42 : f32 to vector<8x16xf32>
      %93 = arith.addf %92, %91 : vector<8x16xf32>
      %94 = arith.divf %92, %93 : vector<8x16xf32>
      %95 = arith.mulf %86, %arg16 : vector<8x16xf32>
      %96 = arith.mulf %80, %88 : vector<8x16xf32>
      %97 = arith.addf %95, %96 : vector<8x16xf32>
      %98 = math.tanh %97 : vector<8x16xf32>
      %99 = arith.mulf %94, %98 : vector<8x16xf32>
      %100 = vector.broadcast %25 : i32 to vector<8x1xi32>
      %101 = arith.cmpi slt, %100, %0 : vector<8x1xi32>
      %cst_43 = arith.constant 0.000000e+00 : f32
      %102 = vector.shape_cast %101 : vector<8x1xi1> to vector<8x1xi1>
      %103 = vector.broadcast %102 : vector<8x1xi1> to vector<8x16xi1>
      %104 = vector.broadcast %cst_43 : f32 to vector<8x16xf32>
      %105 = arith.select %103, %99, %104 : vector<8x16xi1>, vector<8x16xf32>
      %106 = vector.shape_cast %101 : vector<8x1xi1> to vector<8x1xi1>
      %107 = vector.broadcast %106 : vector<8x1xi1> to vector<8x16xi1>
      %108 = arith.select %107, %99, %arg15 : vector<8x16xi1>, vector<8x16xf32>
      %109 = vector.shape_cast %101 : vector<8x1xi1> to vector<8x1xi1>
      %110 = vector.broadcast %109 : vector<8x1xi1> to vector<8x16xi1>
      %111 = arith.select %110, %97, %arg16 : vector<8x16xi1>, vector<8x16xf32>
      %112 = arith.index_cast %arg12 : i32 to index
      %c0_44 = arith.constant 0 : index
      %c0_45 = arith.constant 0 : index
      %113 = vector.load %arg10[%112, %c0_44, %c0_45] : memref<12x8x16xf32, #tpu.memory_space<vmem>>, vector<1x8x16xf32>
      %114 = vector.shape_cast %113 : vector<1x8x16xf32> to vector<8x16xf32>
      %115 = vector.shape_cast %68 : vector<8x16xf32> to vector<1x8x16xf32>
      tpu.vector_store %arg10[%112, %c0_44, %c0_45], %115 {strides = array<i32>} : memref<12x8x16xf32, #tpu.memory_space<vmem>>, vector<1x8x16xf32>,
      %116 = arith.index_cast %25 : i32 to index
      %c0_46 = arith.constant 0 : index
      %c0_47 = arith.constant 0 : index
      %117 = vector.load %arg11[%116, %c0_46, %c0_47] : memref<12x8x16xf32, #tpu.memory_space<vmem>>, vector<1x8x16xf32>
      %118 = vector.shape_cast %117 : vector<1x8x16xf32> to vector<8x16xf32>
      %119 = vector.shape_cast %105 : vector<8x16xf32> to vector<1x8x16xf32>
      tpu.vector_store %arg11[%116, %c0_46, %c0_47], %119 {strides = array<i32>} : memref<12x8x16xf32, #tpu.memory_space<vmem>>, vector<1x8x16xf32>,
      scf.yield %71, %74, %108, %111 : vector<8x16xf32>, vector<8x16xf32>, vector<8x16xf32>, vector<8x16xf32>
    }
    %c12_i32_17 = arith.constant 12 : i32
    %c0_18 = arith.constant 0 : index
    %c0_19 = arith.constant 0 : index
    %c0_20 = arith.constant 0 : index
    %17 = vector.load %arg10[%c0_18, %c0_19, %c0_20] : memref<12x8x16xf32, #tpu.memory_space<vmem>>, vector<12x8x16xf32>
    %18 = vector.shape_cast %17 : vector<12x8x16xf32> to vector<4x3x8x16xf32>
    %cst_21 = arith.constant dense<0xFF800000> : vector<4x8x16xf32>
    %19 = vector.multi_reduction <maximumf>, %18, %cst_21 [1] : vector<4x3x8x16xf32> to vector<4x8x16xf32>
    %c0_22 = arith.constant 0 : index
    %c0_23 = arith.constant 0 : index
    %c0_24 = arith.constant 0 : index
    %20 = vector.load %arg11[%c0_22, %c0_23, %c0_24] : memref<12x8x16xf32, #tpu.memory_space<vmem>>, vector<12x8x16xf32>
    %21 = vector.shape_cast %20 : vector<12x8x16xf32> to vector<4x3x8x16xf32>
    %cst_25 = arith.constant dense<0xFF800000> : vector<4x8x16xf32>
    %22 = vector.multi_reduction <maximumf>, %21, %cst_25 [1] : vector<4x3x8x16xf32> to vector<4x8x16xf32>
    %c0_26 = arith.constant 0 : index
    %c0_27 = arith.constant 0 : index
    %c0_28 = arith.constant 0 : index
    %23 = vector.load %arg7[%c0_26, %c0_27, %c0_28] : memref<4x8x32xf32, #tpu.memory_space<vmem>>, vector<4x8x16xf32>
    tpu.vector_store %arg7[%c0_26, %c0_27, %c0_28], %19 {strides = array<i32>} : memref<4x8x32xf32, #tpu.memory_space<vmem>>, vector<4x8x16xf32>,
    %c0_29 = arith.constant 0 : index
    %c0_30 = arith.constant 0 : index
    %c16 = arith.constant 16 : index
    %24 = vector.load %arg7[%c0_29, %c0_30, %c16] : memref<4x8x32xf32, #tpu.memory_space<vmem>>, vector<4x8x16xf32>
    tpu.vector_store %arg7[%c0_29, %c0_30, %c16], %22 {strides = array<i32>} : memref<4x8x32xf32, #tpu.memory_space<vmem>>, vector<4x8x16xf32>,
    return
  }
  func.func @transform_0(%arg0: i32) -> (i32, i32, i32) {
    %c0_i32 = arith.constant 0 : i32
    %c0_i32_0 = arith.constant 0 : i32
    %c0_i32_1 = arith.constant 0 : i32
    return %c0_i32, %arg0, %c0_i32_0 : i32, i32, i32
  }
  func.func @transform_1(%arg0: i32) -> (i32, i32) {
    %c0_i32 = arith.constant 0 : i32
    %c0_i32_0 = arith.constant 0 : i32
    return %arg0, %c0_i32 : i32, i32
  }
  func.func @transform_2(%arg0: i32) -> (i32, i32) {
    %c0_i32 = arith.constant 0 : i32
    %c0_i32_0 = arith.constant 0 : i32
    %c0_i32_1 = arith.constant 0 : i32
    return %c0_i32, %c0_i32_0 : i32, i32
  }
  func.func @transform_3(%arg0: i32) -> (i32, i32) {
    %c0_i32 = arith.constant 0 : i32
    %c0_i32_0 = arith.constant 0 : i32
    %c0_i32_1 = arith.constant 0 : i32
    return %c0_i32, %c0_i32_0 : i32, i32
  }
  func.func @transform_4(%arg0: i32) -> (i32, i32) {
    %c0_i32 = arith.constant 0 : i32
    %c0_i32_0 = arith.constant 0 : i32
    %c0_i32_1 = arith.constant 0 : i32
    return %c0_i32, %c0_i32_0 : i32, i32
  }
  func.func @transform_5(%arg0: i32) -> (i32, i32) {
    %c0_i32 = arith.constant 0 : i32
    %c0_i32_0 = arith.constant 0 : i32
    %c0_i32_1 = arith.constant 0 : i32
    return %c0_i32, %c0_i32_0 : i32, i32
  }
  func.func @transform_6(%arg0: i32) -> (i32, i32, i32) {
    %c0_i32 = arith.constant 0 : i32
    %c0_i32_0 = arith.constant 0 : i32
    %c0_i32_1 = arith.constant 0 : i32
    return %c0_i32, %arg0, %c0_i32_0 : i32, i32, i32
  }
}

</mosaic_0001>

<bundles_post_ra>
// kernel: tpu_custom_call.1
= control target key start
LH: loop header
LB: loop body
LE: loop exit
PB: predicated region body
PF: predicated region fallthrough
CT: control target
= control target key end

     0   :  { %11 = vsyncpa [#allocation7], 0  ;;  %s1307_s0 = inlined_call_operand.hbm [shape: f32[12,8,32], index: 0, kind: input, shape index: {}]   ;;  %s1308_s1 = inlined_call_operand.vmem [shape: s32[8,1], index: 1, kind: input, shape index: {}]   ;;  %s1309_s2 = inlined_call_operand.hbm [shape: f32[32,128], index: 2, kind: input, shape index: {}]   ;;  %s1310_s3 = inlined_call_operand.vmem [shape: f32[16,64], index: 3, kind: input, shape index: {}]   ;;  %s1311_s4 = inlined_call_operand.hbm [shape: f32[16,64], index: 4, kind: input, shape index: {}]   ;;  %s1312_s5 = inlined_call_operand.vmem [shape: f32[1,128], index: 5, kind: input, shape index: {}]   ;;  %s1313_s6 = inlined_call_operand.hbm [shape: f32[4,8,32], index: 6, kind: output, shape index: {}]  }
   0x1   :  { %12 = vsyncpa [#allocation10], 0 }
   0x2   :  { %13 = vsyncpa [#allocation8], 0  ;;  %s1018_s21 = smov [#allocation9]   ;;  %s1019_s23 = smov [#allocation6]  }
   0x3   :  { %s33_s22 = sshll.u32 %s1018_s21, 4  ;;  %s19_s24 = sshll.u32 %s1019_s23, 4  ;;  %s34_s22 = int_to_ptr.vmem [resolvable:$true] %s33_s22  ;;  %s1069_s24 = int_to_ptr.vmem [resolvable:$true] %s19_s24 }
   0x4   :  { %s884_s27 = scalar_lea.hbm %s1309_s2, 512 }
   0x5   :  { %p885_p0 = scmp.ne.s32.totalorder %s1309_s2, %s884_s27  ;;  %p888_p1 = scmp.lt.u32.totalorder %s884_s27, %s1309_s2 }
   0x7   :  { %p890_p2 = pnand %p888_p1, %p885_p0 }
   0x9   :  { %893 = shalt.err (!%p890_p2)
}
   0xa   :  { %s894_s8 = scalar_lea.vmem %s34_s22, 512  ;;  %p899_p4 = scmp.lt.s32.totalorder %s34_s22, %s34_s22 }
   0xb   :  { %p895_p3 = scmp.ne.s32.totalorder %s34_s22, %s894_s8  ;;  %p900_p5 = scmp.lt.s32.totalorder %s894_s8, %s894_s8 }
   0xd   :  { %p901_p6 = por %p900_p5, %p899_p4 }
   0xf   :  { %p902_p7 = pnand %p901_p6, %p895_p3 }
  0x11   :  { %905 = shalt.err (!%p902_p7)
}
  0x12   :  { %s1020_s9 = smov 128   ;;  %s1021_s10 = smov 8  }
  0x13   :  { %39 = dma.hbm_to_vmem [thread:$0]  %s1309_s2, 512, %s34_s22, [#allocation10], %s1020_s9, %s1020_s9, %s1021_s10  }
  0x14   :  { %s906_s15 = scalar_lea.hbm %s1307_s0, 1536 }
  0x15   :  { %p907_p8 = scmp.ne.s32.totalorder %s1307_s0, %s906_s15  ;;  %p910_p9 = scmp.lt.u32.totalorder %s906_s15, %s1307_s0 }
  0x17   :  { %p912_p10 = pnand %p910_p9, %p907_p8 }
  0x19   :  { %915 = shalt.err (!%p912_p10)
}
  0x1a   :  { %s916_s20 = scalar_lea.vmem %s1069_s24, 1536  ;;  %p921_p12 = scmp.lt.s32.totalorder %s1069_s24, %s1069_s24 }
  0x1b   :  { %p917_p11 = scmp.ne.s32.totalorder %s1069_s24, %s916_s20  ;;  %p922_p13 = scmp.lt.s32.totalorder %s916_s20, %s916_s20 }
  0x1d   :  { %p923_p0 = por %p922_p13, %p921_p12 }
  0x1f   :  { %p924_p1 = pnand %p923_p0, %p917_p11 }
  0x21   :  { %927 = shalt.err (!%p924_p1)
}
  0x22   :  { %25 = dma.hbm_to_vmem [thread:$0]  %s1307_s0, 1536, %s1069_s24, [#allocation7], %s1020_s9, %s1020_s9, %s1021_s10  }
  0x23   :  { %s1022_s22 = smov [#allocation11]   ;;  %s928_s27 = scalar_lea.hbm %s1311_s4, 256 }
  0x24   :  { %s47_s23 = sshll.u32 %s1022_s22, 4  ;;  %p929_p2 = scmp.ne.s32.totalorder %s1311_s4, %s928_s27  ;;  %s48_s23 = int_to_ptr.vmem [resolvable:$true] %s47_s23 }
  0x25   :  { %p932_p3 = scmp.lt.u32.totalorder %s928_s27, %s1311_s4 }
  0x27   :  { %p934_p4 = pnand %p932_p3, %p929_p2 }
  0x29   :  { %937 = shalt.err (!%p934_p4)
}
  0x2a   :  { %s938_s8 = scalar_lea.vmem %s48_s23, 256  ;;  %p943_p6 = scmp.lt.s32.totalorder %s48_s23, %s48_s23 }
  0x2b   :  { %p939_p5 = scmp.ne.s32.totalorder %s48_s23, %s938_s8  ;;  %p944_p7 = scmp.lt.s32.totalorder %s938_s8, %s938_s8 }
  0x2d   :  { %p945_p8 = por %p944_p7, %p943_p6 }
  0x2f   :  { %p946_p9 = pnand %p945_p8, %p939_p5 }
  0x31   :  { %949 = shalt.err (!%p946_p9)
}
  0x32   :  { %53 = dma.hbm_to_vmem [thread:$0]  %s1311_s4, 256, %s48_s23, [#allocation10], %s1020_s9, %s1020_s9, %s1021_s10  }
  0x33   :  { %992 = dma.done.wait [#allocation7], 1536  }
  0x34   :  { %993 = vsyncadd [#allocation7], 4294965760 }
  0x35   :  { %994 = dma.done.wait [#allocation10], 768  }
  0x36   :  { %995 = vsyncadd [#allocation10], 4294966528  ;;  %v1124_v0 = vld [vmem:[%s1308_s1] sm:$0xff]  ;;  %v1134_v2 = vld [vmem:[%s1310_s3 + $0x8] sm:$0xff]  ;;  %vm89_vm0 = vcmask 261120   ;;  %vm251_vm1 = vcmask 523264  }
  0x37   :  { %v1129_v1 = vld [vmem:[%s1310_s3] sm:$0xff]  ;;  %v1138_v4 = vld [vmem:[#allocation11 + $0x8] sm:$0xff]  ;;  %v80_v7 = vld [vmem:[#allocation9 + $0x10] sm:$0xff]  ;;  %s1023_s4 = smov 64   ;;  %v1191_v60 = vmov 0.0   ;;  %v1193_v61 = vmov 0.0  }
  0x38   :  { %v1136_v3 = vld [vmem:[#allocation11] sm:$0xff]  ;;  %v79_v6 = vld [vmem:[#allocation9 + $0x8] sm:$0xff]  ;;  %v81_v8 = vld [vmem:[#allocation9 + $0x18] sm:$0xff]  ;;  %v1195_v62 = vmov 0.0   ;;  %v1197_v63 = vmov 0.0  }
  0x39   :  { %v78_v5 = vld [vmem:[#allocation9] sm:$0xff]  ;;  %v796_v10 = vpack.c.bf16 %v81_v8, %v80_v7  ;;  %v72_v12 = vld [vmem:[#allocation6 + $0x30] sm:$0xff]  ;;  %v67_v13 = vld [vmem:[#allocation6 + $0x8] sm:$0xff] }
  0x3a   :  { %v792_v9 = vpack.c.bf16 %v79_v6, %v78_v5  ;;  %v66_v11 = vld [vmem:[#allocation6] sm:$0xff]  ;;  %769 = vmatprep.mubr.msk.f32.mxu1 %vm89_vm0, %v72_v12  ;;  %v73_v14 = vld [vmem:[#allocation6 + $0x38] sm:$0xff]  ;;  %v68_v15 = vld [vmem:[#allocation6 + $0x10] sm:$0xff] }
  0x3b   :  { %760 = vmatprep.mubr.msk.f32.mxu0 %vm89_vm0, %v66_v11  ;;  %v74_v16 = vld [vmem:[#allocation6 + $0x40] sm:$0xff]  ;;  %v69_v17 = vld [vmem:[#allocation6 + $0x18] sm:$0xff]  ;;  %v75_v18 = vld [vmem:[#allocation6 + $0x48] sm:$0xff] }
  0x3c   :  { %793 = vmatprep.subr.bf16.mxu0 %v792_v9  ;;  %806 = vmatprep.subr.bf16.mxu1 %v792_v9  ;;  %v70_v19 = vld [vmem:[#allocation6 + $0x20] sm:$0xff]  ;;  %v76_v20 = vld [vmem:[#allocation6 + $0x50] sm:$0xff]  ;;  %v71_v21 = vld [vmem:[#allocation6 + $0x28] sm:$0xff] }
  0x3d   :  { %795 = vmatpush3.bf16.msra.mxu0 %v792_v9  ;;  %808 = vmatpush3.bf16.msra.mxu1 %v792_v9  ;;  %v77_v22 = vld [vmem:[#allocation6 + $0x58] sm:$0xff]  ;;  %v711_v23 = vld [vmem:[%s1312_s5] ss:$0 sm:$0xff]  ;;  %s1199_s5 = smov 0  }
  0x3e   :  { %797 = vmatprep.subr.bf16.mxu0 %v796_v10  ;;  %807 = vmatprep.subr.bf16.mxu1 %v796_v10 }
  0x41   :  { %799 = vmatpush3.bf16.msra.mxu0 %v796_v10  ;;  %809 = vmatpush3.bf16.msra.mxu1 %v796_v10 }
  0x44   :  { %761 = vmatmul.mubr.msk.f32.vlgmr.msra.gmra.mrb[0].mxu0 %vm89_vm0, %v67_v13  ;;  %770 = vmatmul.mubr.msk.f32.vlgmr.msra.gmra.mrb[0].mxu1 %vm89_vm0, %v73_v14 }
  0x45   :  { %763 = vmatprep.mubr.msk.f32.mxu0 %vm89_vm0, %v68_v15  ;;  %772 = vmatprep.mubr.msk.f32.mxu1 %vm89_vm0, %v74_v16 }
  0x48   :  { %764 = vmatmul.mubr.msk.f32.gmra.mrb[2].mxu0 %vm89_vm0, %v69_v17  ;;  %773 = vmatmul.mubr.msk.f32.gmra.mrb[2].mxu1 %vm89_vm0, %v75_v18 }
  0x49   :  { %766 = vmatprep.mubr.msk.f32.mxu0 %vm89_vm0, %v70_v19  ;;  %775 = vmatprep.mubr.msk.f32.mxu1 %vm89_vm0, %v76_v20 }
  0x4c   :  { %767 = vmatmul.mubr.msk.f32.gmra.mrb[4].mxu0 %vm89_vm0, %v71_v21  ;;  %776 = vmatmul.mubr.msk.f32.gmra.mrb[4].mxu1 %vm89_vm0, %v77_v22 }
 0x117   :  { %v762_v24 = vpop.f32.mrb[0].mxu0  ;;  %v771_v25 = vpop.f32.mrb[0].mxu1 }
 0x118   :  { %v198_v26 = vadd.f32 %v762_v24, %v711_v23  ;;  %v228_v27 = vadd.f32 %v771_v25, %v711_v23  ;;  %v192_v28 = vpop.f32.mrb[1].mxu0  ;;  %v222_v29 = vpop.f32.mrb[1].mxu1 }
 0x119   :  { %v193_v30 = vadd.f32 %v711_v23, %v192_v28  ;;  %v223_v31 = vadd.f32 %v711_v23, %v222_v29 }
 0x11a   :  { %253 = vst.msk [vmem:[#allocation2 + $0x8] sm:$0xff] %vm251_vm1, %v198_v26  ;;  %259 = vst.msk [vmem:[#allocation2 + $0x38] sm:$0xff] %vm251_vm1, %v228_v27  ;;  %290 = vrot.lane.b32.xlu1 %v228_v27, %s1023_s4  ;;  %278 = vrot.lane.b32.xlu0 %v198_v26, %s1023_s4 }
 0x11b   :  { %252 = vst.msk [vmem:[#allocation2] sm:$0xff] %vm251_vm1, %v193_v30  ;;  %258 = vst.msk [vmem:[#allocation2 + $0x30] sm:$0xff] %vm251_vm1, %v223_v31  ;;  %v765_v32 = vpop.f32.mrb[2].mxu0  ;;  %v774_v33 = vpop.f32.mrb[2].mxu1 }
 0x11c   :  { %v208_v34 = vadd.f32 %v765_v32, %v711_v23  ;;  %v202_v35 = vpop.f32.mrb[3].mxu0  ;;  %v238_v36 = vadd.f32 %v774_v33, %v711_v23  ;;  %v232_v37 = vpop.f32.mrb[3].mxu1 }
 0x11d   :  { %v203_v38 = vadd.f32 %v711_v23, %v202_v35  ;;  %v233_v39 = vadd.f32 %v711_v23, %v232_v37 }
 0x11e   :  { %255 = vst.msk [vmem:[#allocation2 + $0x18] sm:$0xff] %vm251_vm1, %v208_v34  ;;  %261 = vst.msk [vmem:[#allocation2 + $0x48] sm:$0xff] %vm251_vm1, %v238_v36  ;;  %282 = vrot.lane.b32.xlu1 %v208_v34, %s1023_s4  ;;  %276 = vrot.lane.b32.xlu0 %v193_v30, %s1023_s4 }
 0x11f   :  { %254 = vst.msk [vmem:[#allocation2 + $0x10] sm:$0xff] %vm251_vm1, %v203_v38  ;;  %260 = vst.msk [vmem:[#allocation2 + $0x40] sm:$0xff] %vm251_vm1, %v233_v39  ;;  %v768_v40 = vpop.f32.mrb[4].mxu0  ;;  %v777_v41 = vpop.f32.mrb[4].mxu1 }
 0x120   :  { %v218_v42 = vadd.f32 %v768_v40, %v711_v23  ;;  %v212_v43 = vpop.f32.mrb[5].mxu0  ;;  %v248_v44 = vadd.f32 %v777_v41, %v711_v23  ;;  %v242_v45 = vpop.f32.mrb[5].mxu1 }
 0x121   :  { %v213_v46 = vadd.f32 %v711_v23, %v212_v43  ;;  %v243_v47 = vadd.f32 %v711_v23, %v242_v45 }
 0x122   :  { %294 = vrot.lane.b32.xlu1 %v238_v36, %s1023_s4  ;;  %288 = vrot.lane.b32.xlu0 %v223_v31, %s1023_s4  ;;  %257 = vst.msk [vmem:[#allocation2 + $0x28] sm:$0xff] %vm251_vm1, %v218_v42  ;;  %263 = vst.msk [vmem:[#allocation2 + $0x58] sm:$0xff] %vm251_vm1, %v248_v44 }
 0x123   :  { %256 = vst.msk [vmem:[#allocation2 + $0x20] sm:$0xff] %vm251_vm1, %v213_v46  ;;  %262 = vst.msk [vmem:[#allocation2 + $0x50] sm:$0xff] %vm251_vm1, %v243_v47 }
 0x126   :  { %280 = vrot.lane.b32.xlu1 %v203_v38, %s1023_s4  ;;  %292 = vrot.lane.b32.xlu0 %v233_v39, %s1023_s4 }
 0x12a   :  { %286 = vrot.lane.b32.xlu1 %v218_v42, %s1023_s4  ;;  %284 = vrot.lane.b32.xlu0 %v213_v46, %s1023_s4 }
 0x12e   :  { %298 = vrot.lane.b32.xlu1 %v248_v44, %s1023_s4  ;;  %296 = vrot.lane.b32.xlu0 %v243_v47, %s1023_s4 }
 0x18c   :  { %v291_v48 = vpop.permute.xlu1 %290  ;;  %v279_v49 = vpop.permute.xlu0 %278 }
 0x18d   :  { %319 = vst.msk [vmem:[#allocation3 + $0x38] sm:$0xff] %vm251_vm1, %v291_v48  ;;  %313 = vst.msk [vmem:[#allocation3 + $0x8] sm:$0xff] %vm251_vm1, %v279_v49 }
 0x190   :  { %v283_v50 = vpop.permute.xlu1 %282  ;;  %v277_v51 = vpop.permute.xlu0 %276 }
 0x191   :  { %315 = vst.msk [vmem:[#allocation3 + $0x18] sm:$0xff] %vm251_vm1, %v283_v50  ;;  %312 = vst.msk [vmem:[#allocation3] sm:$0xff] %vm251_vm1, %v277_v51 }
 0x194   :  { %v295_v52 = vpop.permute.xlu1 %294  ;;  %v289_v53 = vpop.permute.xlu0 %288 }
 0x195   :  { %321 = vst.msk [vmem:[#allocation3 + $0x48] sm:$0xff] %vm251_vm1, %v295_v52  ;;  %318 = vst.msk [vmem:[#allocation3 + $0x30] sm:$0xff] %vm251_vm1, %v289_v53 }
 0x198   :  { %v281_v54 = vpop.permute.xlu1 %280  ;;  %v293_v55 = vpop.permute.xlu0 %292 }
 0x199   :  { %314 = vst.msk [vmem:[#allocation3 + $0x10] sm:$0xff] %vm251_vm1, %v281_v54  ;;  %320 = vst.msk [vmem:[#allocation3 + $0x40] sm:$0xff] %vm251_vm1, %v293_v55 }
 0x19c   :  { %v287_v56 = vpop.permute.xlu1 %286  ;;  %v285_v57 = vpop.permute.xlu0 %284 }
 0x19d   :  { %317 = vst.msk [vmem:[#allocation3 + $0x28] sm:$0xff] %vm251_vm1, %v287_v56  ;;  %316 = vst.msk [vmem:[#allocation3 + $0x20] sm:$0xff] %vm251_vm1, %v285_v57 }
 0x1a0   :  { %v299_v58 = vpop.permute.xlu1 %298  ;;  %v297_v59 = vpop.permute.xlu0 %296 }
 0x1a1   :  { %323 = vst.msk [vmem:[#allocation3 + $0x58] sm:$0xff] %vm251_vm1, %v299_v58  ;;  %322 = vst.msk [vmem:[#allocation3 + $0x50] sm:$0xff] %vm251_vm1, %v297_v59 }
 0x1a2 LB: > { %v801_v5 = vpack.c.bf16 %v1134_v2, %v1129_v1  ;;  %v1024_v6 = vmov 0.0|0.0   ;;  %s1025_s17 = smov 80   ;;  %v804_v7 = vpack.c.bf16 %v1138_v4, %v1136_v3  ;;  %vm1026_vm2 = vmmov 0   ;;  %s724_s18 = sshll.u32 %s1016_s5, 3  ;;  %s1016_s5 = sphi %s1199_s5, %s333_s5   ;;  %v1012_v63 = vphi %v1197_v63, %v530_v63   ;;  %v1008_v62 = vphi %v1195_v62, %v531_v62   ;;  %v1004_v61 = vphi %v1193_v61, %v564_v61   ;;  %v1000_v60 = vphi %v1191_v60, %v565_v60  }
 0x1a3   : > { %800 = vmatprep.subr.bf16.mxu0 %v1024_v6  ;;  %803 = vmatprep.subr.bf16.mxu1 %v1024_v6  ;;  %v1027_v8 = vmov 0.0   ;;  %vm348_vm3 = vcmask 130048   ;;  %s338_s19 = ssub.s32 11, %s1016_s5  ;;  %s340_s2 = scalar_lea.vmem [#allocation2], %s724_s18  ;;  %v1028_v19 = vmov 0   ;;  %v522_v28 = vstv %s1016_s5 }
 0x1a4   : > { %346 = vrot.lane.b32.xlu0 %v1012_v63, %s1025_s17  ;;  %802 = vmatpush3.bf16.msra.mxu0 %v801_v5  ;;  %s1230_s20 = sshll.u32 %s338_s19, 3  ;;  %v341_v11 = vld [vmem:[%s340_s2] sm:$0xff]  ;;  %s1029_s22 = smov 96   ;;  %vm523_vm4 = vcmp.lt.s32.totalorder %v522_v28, %v1124_v0  ;;  %v556_v32 = vstv %s338_s19 }
 0x1a5   : > { %782 = vmatprep.mubr.msk.f32.mxu0 %vm1026_vm2, %v1027_v8  ;;  %789 = vmatprep.mubr.msk.f32.mxu1 %vm1026_vm2, %v1027_v8  ;;  %s343_s21 = scalar_lea.vmem [#allocation3], %s1230_s20  ;;  %s1030_s23 = smov 16   ;;  %v524_v35 = vsel %vm523_vm4, 1, %v1028_v19  ;;  %vm557_vm5 = vcmp.lt.s32.totalorder %v556_v32, %v1124_v0 }
 0x1a6   : > { %805 = vmatpush3.bf16.msra.mxu1 %v804_v7  ;;  %866 = vset.pattern.permute.xlu0 %v1028_v19  ;;  %v558_v37 = vsel %vm557_vm5, 1, %v1028_v19  ;;  %s1031_s25 = smov 32   ;;  %s570_s26 = scalar_lea.vmem [#allocation4], %s724_s18 }
 0x1a7   : > { %867 = vset.pattern.permute.xlu1 %v1028_v19  ;;  %s576_s27 = scalar_lea.vmem [#allocation5], %s1230_s20  ;;  %s333_s5 = sadd.s32 1, %s1016_s5  }
 0x1a8   : > { %423 = vrot.lane.b32.xlu0 %v1004_v61, %s1025_s17  ;;  %v344_v15 = vld [vmem:[%s343_s21] sm:$0xff]  ;;  %p330_p10 = scmp.ge.s32.totalorder %s333_s5, 12  }
 0x1a9   :  { %s1032_s28 = smov (%p330_p10), 16   ;;  %vm663_vm8 = vcmask (%p330_p10), 261248   ;;  %s1033_s29 = smov (%p330_p10), [#allocation12]  }
 0x1aa   :  { %s673_s30 = sshll.u32 (%p330_p10), %s1033_s29, 4  ;;  %s674_s30 = int_to_ptr.vmem [resolvable:$true] %s673_s30 }
 0x1ab   :  { %s950_s7 = scalar_lea.vmem (%p330_p10), %s674_s30, 512  ;;  %p955_p12 = scmp.lt.s32.totalorder (%p330_p10), %s674_s30, %s674_s30 }
 0x1ac   :  { %p951_p11 = scmp.ne.s32.totalorder (%p330_p10), %s674_s30, %s950_s7  ;;  %p956_p13 = scmp.lt.s32.totalorder (%p330_p10), %s950_s7, %s950_s7 }
 0x1ae   :  { %p957_p0 = por (%p330_p10), %p956_p13, %p955_p12 }
 0x1b0   :  { %p958_p1 = pnand (%p330_p10), %p957_p0, %p951_p11 }
 0x216   : > { %v347_v9 = vpop.permute.xlu0 %346 }
 0x217   : > { %783 = vmatmul.mubr.msk.f32.vlgmr.msra.gmra.mrb[0].mxu0 %vm348_vm3, %v347_v9 }
 0x21a   : > { %v424_v10 = vpop.permute.xlu0 %423 }
 0x21b   : > { %790 = vmatmul.mubr.msk.f32.vlgmr.msra.gmra.mrb[0].mxu1 %vm348_vm3, %v424_v10 }
 0x2ea   : > { %v417_v12 = vpop.f32.mrb[0].mxu0 }
 0x2eb   : > { %v421_v13 = vadd.f32 %v417_v12, %v341_v11  ;;  %v784_v14 = vpop.f32.mrb[1].mxu0 }
 0x2ed   : > { %868 = vtanh.f32 %v421_v13  ;;  %v728_v22 = vmul.f32 -1.442695, %v421_v13 }
 0x2ee   : > { %v493_v16 = vpop.f32.mrb[0].mxu1 }
 0x2ef   : > { %v497_v17 = vadd.f32 %v493_v16, %v344_v15  ;;  %v791_v18 = vpop.f32.mrb[1].mxu1 }
 0x2f1   : > { %870 = vtanh.f32 %v497_v17  ;;  %v729_v23 = vmul.f32 -1.442695, %v497_v17 }
 0x2f2   : > { %872 = vpow2.f32 %v728_v22 }
 0x2f3   : > { %874 = vpow2.f32 %v729_v23 }
 0x2f7   : > { %v869_v20 = vpop.eup %868 }
 0x2f8   : > { %507 = vrot.lane.b32.xlu1 %v869_v20, %s1029_s22 }
 0x2fb   : > { %v871_v21 = vpop.eup %870 }
 0x2fc   : > { %541 = vrot.lane.b32.xlu1 %v871_v21, %s1029_s22  ;;  %v873_v24 = vpop.eup %872 }
 0x2fd   : > { %v501_v25 = vadd.f32 1.0, %v873_v24  ;;  %v875_v26 = vpop.eup %874 }
 0x2fe   : > { %v535_v27 = vadd.f32 1.0, %v875_v26 }
 0x2ff   : > { %876 = vrcp.f32 %v501_v25 }
 0x300   : > { %878 = vrcp.f32 %v535_v27 }
 0x309   : > { %v877_v29 = vpop.eup %876 }
 0x30a   : > { %v879_v33 = vpop.eup %878  ;;  %v505_v38 = vmul.f32 %v1008_v62, %v877_v29 }
 0x30b   : > { %v539_v41 = vmul.f32 %v1000_v60, %v879_v33 }
 0x36a   : > { %v508_v30 = vpop.permute.xlu1 %507 }
 0x36b   : > { %v510_v31 = vmul.f32 %v877_v29, %v508_v30 }
 0x36d   : > { %512 = vrot.lane.b32.xlu0 %v510_v31, %s1030_s23 }
 0x36e   : > { %v542_v34 = vpop.permute.xlu1 %541 }
 0x36f   : > { %v544_v36 = vmul.f32 %v879_v33, %v542_v34 }
 0x371   : > { %526 = vperm.xlu0 %866, %v524_v35   ;;  %546 = vrot.lane.b32.xlu1 %v544_v36, %s1030_s23 }
 0x375   : > { %560 = vperm.xlu1 %867, %v558_v37  }
 0x3df   : > { %v513_v39 = vpop.permute.xlu0 %512 }
 0x3e0   : > { %v515_v40 = vadd.f32 %v513_v39, %v505_v38 }
 0x3e2   : > { %880 = vtanh.f32 %v515_v40 }
 0x3e3   : > { %v547_v42 = vpop.permute.xlu1 %546 }
 0x3e4   : > { %v549_v43 = vadd.f32 %v547_v42, %v539_v41 }
 0x3e6   : > { %882 = vtanh.f32 %v549_v43 }
 0x3ec   : > { %v881_v44 = vpop.eup %880 }
 0x3ed   : > { %518 = vrot.lane.b32.xlu1 %v881_v44, %s1031_s25 }
 0x3f0   : > { %v883_v45 = vpop.eup %882  ;;  %v527_v46 = vpop.permute.xlu0 %526 }
 0x3f1   : > { %vm528_vm6 = vcmp.eq.s32.totalorder %v527_v46, 1  ;;  %552 = vrot.lane.b32.xlu0 %v883_v45, %s1031_s25 }
 0x3f2   : > { %v531_v62 = vsel %vm528_vm6, %v515_v40, %v1008_v62  }
 0x3f4   : > { %v561_v47 = vpop.permute.xlu1 %560 }
 0x3f5   : > { %vm562_vm7 = vcmp.eq.s32.totalorder %v561_v47, 1 }
 0x3f6   : > { %v565_v60 = vsel %vm562_vm7, %v549_v43, %v1000_v60  }
 0x45f   : > { %v519_v48 = vpop.permute.xlu1 %518 }
 0x460   : > { %v521_v49 = vmul.f32 %v877_v29, %v519_v48 }
 0x462   : > { %v530_v63 = vsel %vm528_vm6, %v521_v49, %v1012_v63   ;;  %v529_v50 = vsel %vm528_vm6, %v521_v49, 0.0 }
 0x463   : > { %567 = vrot.lane.b32.xlu1 %v529_v50, %s1025_s17  ;;  %v553_v51 = vpop.permute.xlu0 %552 }
 0x464   : > { %v555_v52 = vmul.f32 %v879_v33, %v553_v51 }
 0x466   : > { %v564_v61 = vsel %vm562_vm7, %v555_v52, %v1004_v61   ;;  %v563_v53 = vsel %vm562_vm7, %v555_v52, 0.0 }
 0x467   : > { %573 = vrot.lane.b32.xlu0 %v563_v53, %s1025_s17 }
 0x4d4   :  { %332 = sbr.rel (!%p330_p10) target bundleno = 418 (0x1a2), region = 67 }
 0x4d5   : > { %v568_v54 = vpop.permute.xlu1 %567 }
 0x4d6   : > { %571 = vst.msk [vmem:[%s570_s26] sm:$0xff] %vm348_vm3, %v568_v54 }
 0x4d9   : > { %v574_v55 = vpop.permute.xlu0 %573 }
 0x4da   : > { %577 = vst.msk [vmem:[%s576_s27] sm:$0xff] %vm348_vm3, %v574_v55 }
 0x4dd   :  { %v584_v19 = vld [vmem:[#allocation4 + $0x30] sm:$0xff]  ;;  %v585_v20 = vld [vmem:[#allocation4 + $0x38] sm:$0xff]  ;;  %v586_v21 = vld [vmem:[#allocation4 + $0x40] sm:$0xff] }
 0x4de   :  { %v601_v25 = vsel %vm348_vm3, %v584_v19, -inf  ;;  %v578_v26 = vld [vmem:[#allocation4] sm:$0xff]  ;;  %v579_v27 = vld [vmem:[#allocation4 + $0x8] sm:$0xff]  ;;  %v580_v28 = vld [vmem:[#allocation4 + $0x10] sm:$0xff]  ;;  %v602_v30 = vsel %vm348_vm3, %v585_v20, -inf  ;;  %v604_v31 = vsel %vm348_vm3, %v586_v21, -inf }
 0x4df   :  { %v591_v32 = vsel %vm348_vm3, %v578_v26, -inf  ;;  %v587_v33 = vld [vmem:[#allocation4 + $0x48] sm:$0xff]  ;;  %v588_v34 = vld [vmem:[#allocation4 + $0x50] sm:$0xff]  ;;  %v589_v35 = vld [vmem:[#allocation4 + $0x58] sm:$0xff]  ;;  %v603_v37 = vmax.f32 %v601_v25, %v602_v30  ;;  %v592_v38 = vsel %vm348_vm3, %v579_v27, -inf  ;;  %v594_v39 = vsel %vm348_vm3, %v580_v28, -inf }
 0x4e0   :  { %v581_v40 = vld [vmem:[#allocation4 + $0x18] sm:$0xff]  ;;  %v582_v41 = vld [vmem:[#allocation4 + $0x20] sm:$0xff]  ;;  %v583_v42 = vld [vmem:[#allocation4 + $0x28] sm:$0xff]  ;;  %v593_v43 = vmax.f32 %v591_v32, %v592_v38  ;;  %v606_v44 = vsel %vm348_vm3, %v587_v33, -inf  ;;  %v607_v45 = vsel %vm348_vm3, %v588_v34, -inf  ;;  %v609_v46 = vsel %vm348_vm3, %v589_v35, -inf }
 0x4e1   :  { %v617_v56 = vld [vmem:[#allocation5 + $0x30] sm:$0xff]  ;;  %v618_v57 = vld [vmem:[#allocation5 + $0x38] sm:$0xff]  ;;  %v619_v58 = vld [vmem:[#allocation5 + $0x40] sm:$0xff]  ;;  %v605_v47 = vmax.f32 %v603_v37, %v604_v31  ;;  %v608_v48 = vmax.f32 %v606_v44, %v607_v45  ;;  %v596_v49 = vsel %vm348_vm3, %v581_v40, -inf  ;;  %v597_v50 = vsel %vm348_vm3, %v582_v41, -inf }
 0x4e2   :  { %v633_v59 = vsel %vm348_vm3, %v617_v56, -inf  ;;  %v634_v5 = vsel %vm348_vm3, %v618_v57, -inf  ;;  %v636_v6 = vsel %vm348_vm3, %v619_v58, -inf  ;;  %v611_v7 = vld [vmem:[#allocation5] sm:$0xff]  ;;  %v612_v8 = vld [vmem:[#allocation5 + $0x8] sm:$0xff]  ;;  %v613_v9 = vld [vmem:[#allocation5 + $0x10] sm:$0xff]  ;;  %v595_v51 = vmax.f32 %v593_v43, %v594_v39 }
 0x4e3   :  { %v635_v10 = vmax.f32 %v633_v59, %v634_v5  ;;  %v623_v11 = vsel %vm348_vm3, %v611_v7, -inf  ;;  %v624_v63 = vsel %vm348_vm3, %v612_v8, -inf  ;;  %v626_v12 = vsel %vm348_vm3, %v613_v9, -inf  ;;  %v620_v13 = vld [vmem:[#allocation5 + $0x48] sm:$0xff]  ;;  %v621_v0 = vld [vmem:[#allocation5 + $0x50] sm:$0xff]  ;;  %v622_v1 = vld [vmem:[#allocation5 + $0x58] sm:$0xff] }
 0x4e4   :  { %v625_v2 = vmax.f32 %v623_v11, %v624_v63  ;;  %v638_v3 = vsel %vm348_vm3, %v620_v13, -inf  ;;  %v639_v4 = vsel %vm348_vm3, %v621_v0, -inf  ;;  %v641_v60 = vsel %vm348_vm3, %v622_v1, -inf  ;;  %v614_v61 = vld [vmem:[#allocation5 + $0x18] sm:$0xff]  ;;  %v615_v62 = vld [vmem:[#allocation5 + $0x20] sm:$0xff]  ;;  %v616_v14 = vld [vmem:[#allocation5 + $0x28] sm:$0xff] }
 0x4e5   :  { %v637_v15 = vmax.f32 %v635_v10, %v636_v6  ;;  %v640_v16 = vmax.f32 %v638_v3, %v639_v4  ;;  %v628_v17 = vsel %vm348_vm3, %v614_v61, -inf  ;;  %v629_v18 = vsel %vm348_vm3, %v615_v62, -inf  ;;  %645 = vst.msk [vmem:[#allocation12 + $0x10] sm:$0xff] %vm348_vm3, %v605_v47  ;;  %643 = vst.msk [vmem:[#allocation12] sm:$0xff] %vm348_vm3, %v595_v51 }
 0x4e6   :  { %v627_v22 = vmax.f32 %v625_v2, %v626_v12  ;;  %v630_v23 = vmax.f32 %v628_v17, %v629_v18  ;;  %v631_v24 = vsel %vm348_vm3, %v616_v14, -inf  ;;  %v598_v52 = vmax.f32 %v596_v49, %v597_v50 }
 0x4e7   :  { %655 = vrot.lane.b32.xlu1 %v637_v15, %s1032_s28  ;;  %v642_v29 = vmax.f32 %v640_v16, %v641_v60  ;;  %v599_v53 = vsel %vm348_vm3, %v583_v42, -inf  ;;  %v610_v54 = vmax.f32 %v608_v48, %v609_v46 }
 0x4e8   :  { %651 = vrot.lane.b32.xlu0 %v627_v22, %s1032_s28  ;;  %v632_v36 = vmax.f32 %v630_v23, %v631_v24  ;;  %v600_v55 = vmax.f32 %v598_v52, %v599_v53 }
 0x4e9   :  { %646 = vst.msk [vmem:[#allocation12 + $0x18] sm:$0xff] %vm348_vm3, %v610_v54 }
 0x4ea   :  { %644 = vst.msk [vmem:[#allocation12 + $0x8] sm:$0xff] %vm348_vm3, %v600_v55 }
 0x4eb   :  { %657 = vrot.lane.b32.xlu1 %v642_v29, %s1032_s28 }
 0x4ec   :  { %653 = vrot.lane.b32.xlu0 %v632_v36, %s1032_s28 }
 0x559   :  { %v656_v56 = vpop.permute.xlu1 %655 }
 0x55a   :  { %666 = vst.msk [vmem:[#allocation12 + $0x10] sm:$0xff] %vm663_vm8, %v656_v56  ;;  %v652_v57 = vpop.permute.xlu0 %651 }
 0x55b   :  { %664 = vst.msk [vmem:[#allocation12] sm:$0xff] %vm663_vm8, %v652_v57 }
 0x55d   :  { %v658_v58 = vpop.permute.xlu1 %657 }
 0x55e   :  { %667 = vst.msk [vmem:[#allocation12 + $0x18] sm:$0xff] %vm663_vm8, %v658_v58  ;;  %v654_v59 = vpop.permute.xlu0 %653 }
 0x55f   :  { %665 = vst.msk [vmem:[#allocation12 + $0x8] sm:$0xff] %vm663_vm8, %v654_v59 }
 0x560   :  { %961 = shalt.err (!%p958_p1)
}
 0x561   :  { %s962_s24 = scalar_lea.hbm %s1313_s6, 512 }
 0x562   :  { %p963_p2 = scmp.ne.s32.totalorder %s1313_s6, %s962_s24  ;;  %p966_p3 = scmp.lt.u32.totalorder %s962_s24, %s1313_s6 }
 0x564   :  { %p968_p4 = pnand %p966_p3, %p963_p2 }
 0x566   :  { %971 = shalt.err (!%p968_p4)
}
 0x567   :  { %679 = dma.vmem_to_hbm [thread:$0]  %s674_s30, 512, %s1313_s6, [#allocation8], %s1020_s9, %s1020_s9, %s1021_s10  }
 0x568   :  { %996 = dma.done.wait [#allocation8], 512  }
 0x569   :  { %997 = vsyncadd [#allocation8], 4294966784 }
 0x56a   :  { %683 = vsyncpa [#allocation7], 1 }
 0x56b   :  { %684 = vsyncpa [#allocation10], 1 }
 0x56c   :  { %685 = vsyncpa [#allocation8], 1 }

</bundles_post_ra>
